<compile_context>
chip_gen: v7x
topology: tpu7x:2x2x1
jax: 0.10.0
libtpu: 0.0.40
codegen_flags: <defaults>
</compile_context>

<pallas_src>
import functools

import jax
import jax.numpy as jnp
from jax import lax
from jax.experimental import pallas as pl
from jax.experimental.pallas import tpu as pltpu


def _round_up(x: int, m: int) -> int:
    return ((x + m - 1) // m) * m


def _semi_loss_kernel(flags_ref, x_ref, xc_ref, y_ref, mask_ref,
                      part_ref, acc_ref, *,
                      threshold, inv_temp, rows_per_group,
                      batch, classes, tile_b, tile_c,
                      need_row_mask, need_col_mask):
    i = pl.program_id(0)
    j = pl.program_id(1)

    # Fresh accumulator per batch tile (safe with "parallel" batch axis: each
    # core re-inits its own scratch at the start of every inner j-loop).
    @pl.when(j == 0)
    def _init():
        acc_ref[...] = jnp.zeros_like(acc_ref)

    x = x_ref[...].astype(jnp.float32)       # predictions in (0, 1)
    xc = xc_ref[...].astype(jnp.float32)     # consistency-branch predictions

    # Validity mask for ragged edge tiles. Only traced when shapes are not
    # (tb, tc)-aligned; jnp.where (select) neutralizes any garbage (incl. NaN)
    # read from the undefined padding region of the VMEM block.
    valid = None
    if need_row_mask:
        rows = lax.broadcasted_iota(jnp.int32, (tile_b, tile_c), 0) + i * tile_b
        valid = rows < batch
    if need_col_mask:
        cols = lax.broadcasted_iota(jnp.int32, (tile_b, tile_c), 1) + j * tile_c
        cv = cols < classes
        valid = cv if valid is None else jnp.logical_and(valid, cv)

    def fold(contrib):
        if valid is not None:
            contrib = jnp.where(valid, contrib, 0.0)
        # Fold sublane groups with plain VPU adds; defer lane reduce to the end.
        acc_ref[...] += contrib.reshape(rows_per_group, 8, tile_c).sum(axis=0)

    # Temperature sharpening, algebraically reduced:
    #   sharp = x + (sel - x)/T  with  sel = 1[x > threshold]
    #   d_pseudo = x  - sharp = (x - sel) * inv_temp
    #   d_cons   = xc - sharp = (xc - x) + d_pseudo
    sel = jnp.where(x > threshold, 1.0, 0.0)
    d_pseudo = (x - sel) * inv_temp
    d_cons = (xc - x) + d_pseudo
    base = d_pseudo * d_pseudo + d_cons * d_cons

    @pl.when(flags_ref[i] != 0)
    def _labeled_tile():
        y = y_ref[...].astype(jnp.float32)
        m = mask_ref[...]                              # (tb, 1): 1 iff source in {0,1}
        # BCE with torch.nn.BCELoss-style log clamp (>= -100); negate folded in.
        log_x = jnp.maximum(jnp.log(x), -100.0)
        log_1mx = jnp.maximum(jnp.log(1.0 - x), -100.0)
        fold(base - m * (log_1mx + y * (log_x - log_1mx)))

    @pl.when(flags_ref[i] == 0)
    def _unlabeled_tile():
        fold(base)                                     # skip the 2 logs entirely

    @pl.when(j == pl.num_programs(1) - 1)
    def _finalize():
        # Lane-dense (8, 128) partial per batch tile (unmasked vst), once per i.
        part_ref[...] = acc_ref[...].reshape(8, tile_c // 128, 128).sum(axis=1)


def semi_loss(output, output_consistency, label, source,
              threshold=0.5, temperature=4.0,
              tile_b=512, tile_c=2048,
              vmem_limit_bytes=48 * 1024 * 1024):
    """output, output_consistency, label: (B, C) float arrays; source: (B,) ints."""
    B, C = output.shape

    # Tile sizes (8/128-aligned); ragged edges handled in-kernel (no jnp.pad of
    # the big (B, C) streams, so no extra HBM pass and no dead reads).
    tb = min(int(tile_b), _round_up(B, 8))
    tc = min(int(tile_c), _round_up(C, 128))
    nb = pl.cdiv(B, tb)
    nc = pl.cdiv(C, tc)

    # Source mask: rows whose source is 0 or 1 contribute to the BCE term.
    labeled = jnp.logical_or(source == 0, source == 1)
    mask = labeled.astype(jnp.float32).reshape(B, 1)

    # Per-batch-tile "has any labeled row" flags (tiny; goes through scalar
    # prefetch into SMEM so unlabeled tiles skip the BCE block).
    lab_pad = jnp.zeros((nb * tb,), jnp.bool_).at[:B].set(labeled)
    flags = lab_pad.reshape(nb, tb).any(axis=1).astype(jnp.int32)

    kernel = functools.partial(
        _semi_loss_kernel,
        threshold=float(threshold),
        inv_temp=1.0 / float(temperature),
        rows_per_group=tb // 8,
        batch=B, classes=C, tile_b=tb, tile_c=tc,
        need_row_mask=(B % tb) != 0,
        need_col_mask=(C % tc) != 0,
    )

    itemsize = jnp.dtype(output.dtype).itemsize
    cost = pl.CostEstimate(
        flops=15 * B * C,
        transcendentals=2 * B * C,
        bytes_accessed=(2 * itemsize + jnp.dtype(label.dtype).itemsize) * B * C
                       + 4 * B + nb * 4 + nb * 8 * 128 * 4,
    )

    partials = pl.pallas_call(
        kernel,
        out_shape=jax.ShapeDtypeStruct((nb * 8, 128), jnp.float32),
        grid_spec=pltpu.PrefetchScalarGridSpec(
            num_scalar_prefetch=1,
            grid=(nb, nc),
            in_specs=[
                pl.BlockSpec((tb, tc), lambda i, j, f: (i, j)),
                pl.BlockSpec((tb, tc), lambda i, j, f: (i, j)),
                pl.BlockSpec((tb, tc), lambda i, j, f: (i, j)),
                pl.BlockSpec((tb, 1), lambda i, j, f: (i, 0)),   # batch-only map
            ],
            out_specs=pl.BlockSpec((8, 128), lambda i, j, f: (i, 0)),
            scratch_shapes=[pltpu.VMEM((8, tc), jnp.float32)],
        ),
        compiler_params=pltpu.CompilerParams(
            dimension_semantics=("parallel", "arbitrary"),
            vmem_limit_bytes=vmem_limit_bytes,
        ),
        cost_estimate=cost,
    )(flags, output, output_consistency, label, mask)

    return jnp.sum(partials) / B


def semi_loss_ref(output, output_consistency, label, source,
                  threshold=0.5, temperature=4.0):
    """Pure-JAX reference mirroring the PyTorch SemiLoss forward loop."""
    x = output.astype(jnp.float32)
    xc = output_consistency.astype(jnp.float32)
    y = label.astype(jnp.float32)
    log_x = jnp.maximum(jnp.log(x), -100.0)
    log_1mx = jnp.maximum(jnp.log(1.0 - x), -100.0)
    bce = -(y * log_x + (1.0 - y) * log_1mx)
    m = jnp.logical_or(source == 0, source == 1).astype(jnp.float32)[:, None]
    out_sharp = jnp.where(x > threshold,
                          x + (1.0 - x) / temperature,
                          x - x / temperature)
    pseudo = (x - out_sharp) ** 2
    cons = (xc - out_sharp) ** 2
    total = jnp.sum(bce * m) + jnp.sum(pseudo) + jnp.sum(cons)
    return total / x.shape[0]


if __name__ == "__main__":
    key = jax.random.PRNGKey(0)
    k1, k2, k3 = jax.random.split(key, 3)

    B, C = 2, 4
    # BCELoss expects probabilities; build them from logits via sigmoid.
    output = jax.nn.sigmoid(jax.random.normal(k1, (B, C), dtype=jnp.float32))
    output_consistency = jax.nn.sigmoid(jax.random.normal(k2, (B, C), dtype=jnp.float32))
    label = jax.random.bernoulli(k3, 0.5, (B, C)).astype(jnp.float32)

    # Labeled rows (source in {0,1}): exercises BCE branch + ragged-edge masking.
    source = jnp.array([0, 1], dtype=jnp.int32)
    loss = semi_loss(output, output_consistency, label, source)
    jax.block_until_ready(loss)
    ref = semi_loss_ref(output, output_consistency, label, source)
    assert jnp.allclose(loss, ref, rtol=1e-5, atol=1e-6), (loss, ref)

    # Unlabeled rows: exercises the BCE-skip (scalar-prefetch flag) branch.
    source_u = jnp.array([2, 3], dtype=jnp.int32)
    loss_u = semi_loss(output, output_consistency, label, source_u)
    jax.block_until_ready(loss_u)
    ref_u = semi_loss_ref(output, output_consistency, label, source_u)
    assert jnp.allclose(loss_u, ref_u, rtol=1e-5, atol=1e-6), (loss_u, ref_u)

    # Aligned shapes + bf16 streams: exercises the no-masking fast path.
    B2, C2 = 16, 256
    ka, kb, kc, kd = jax.random.split(jax.random.PRNGKey(0), 4)
    out2 = jax.nn.sigmoid(jax.random.normal(ka, (B2, C2))).astype(jnp.bfloat16)
    cons2 = jax.nn.sigmoid(jax.random.normal(kb, (B2, C2))).astype(jnp.bfloat16)
    lab2 = jax.random.bernoulli(kc, 0.5, (B2, C2)).astype(jnp.bfloat16)
    src2 = jax.random.randint(kd, (B2,), 0, 3)
    loss2 = semi_loss(out2, cons2, lab2, src2)
    jax.block_until_ready(loss2)
    ref2 = semi_loss_ref(out2, cons2, lab2, src2)
    assert jnp.allclose(loss2, ref2, rtol=1e-5, atol=1e-6), (loss2, ref2)

    print("KERNEL_OK")
</pallas_src>

<mosaic_0001>
module attributes {stable_mosaic.version = 11 : i64} {
  func.func @_semi_loss_kernel(%arg0: i32, %arg1: i32, %arg2: memref<1xi32, #tpu.memory_space<smem>>, %arg3: memref<8x128xf32, #tpu.memory_space<vmem>>, %arg4: memref<8x128xf32, #tpu.memory_space<vmem>>, %arg5: memref<8x128xf32, #tpu.memory_space<vmem>>, %arg6: memref<8x1xf32, #tpu.memory_space<vmem>>, %arg7: memref<8x128xf32, #tpu.memory_space<vmem>>, %arg8: memref<8x128xf32, #tpu.memory_space<vmem>>) attributes {dimension_semantics = [#tpu.dimension_semantics<parallel>, #tpu.dimension_semantics<arbitrary>], iteration_bounds = array<i64: 1, 1>, scalar_prefetch = 1 : i64, scratch_operands = 1 : i64, tpu.core_type = #tpu.core_type<tc>, window_params = [{transform_indices = @transform_0, window_bounds = array<i64: 8, 128>}, {transform_indices = @transform_1, window_bounds = array<i64: 8, 128>}, {transform_indices = @transform_2, window_bounds = array<i64: 8, 128>}, {transform_indices = @transform_3, window_bounds = array<i64: 8, 1>}, {transform_indices = @transform_4, window_bounds = array<i64: 8, 128>}]} {
    %c0_i32 = arith.constant 0 : i32
    %0 = arith.cmpi eq, %arg1, %c0_i32 : i32
    %1 = arith.extui %0 : i1 to i32
    %c0_i32_0 = arith.constant 0 : i32
    %2 = arith.cmpi ne, %1, %c0_i32_0 : i32
    scf.if %2 {
      %cst_13 = arith.constant 0.000000e+00 : f32
      %44 = vector.broadcast %cst_13 : f32 to vector<8x128xf32>
      %c0_14 = arith.constant 0 : index
      %c0_15 = arith.constant 0 : index
      %45 = vector.load %arg8[%c0_14, %c0_15] : memref<8x128xf32, #tpu.memory_space<vmem>>, vector<8x128xf32>
      tpu.vector_store %arg8[%c0_14, %c0_15], %44 {strides = array<i32>} : memref<8x128xf32, #tpu.memory_space<vmem>>, vector<8x128xf32>,
    } else {
    }
    %c0 = arith.constant 0 : index
    %c0_1 = arith.constant 0 : index
    %3 = vector.load %arg3[%c0, %c0_1] : memref<8x128xf32, #tpu.memory_space<vmem>>, vector<8x128xf32>
    %c0_2 = arith.constant 0 : index
    %c0_3 = arith.constant 0 : index
    %4 = vector.load %arg4[%c0_2, %c0_3] : memref<8x128xf32, #tpu.memory_space<vmem>>, vector<8x128xf32>
    %5 = tpu.iota {dimensions = array<i32: 0>} : vector<8x128xi32>
    %c8_i32 = arith.constant 8 : i32
    %6 = arith.muli %arg0, %c8_i32 : i32
    %7 = vector.broadcast %6 : i32 to vector<8x128xi32>
    %8 = arith.addi %5, %7 : vector<8x128xi32>
    %c2_i32 = arith.constant 2 : i32
    %9 = vector.broadcast %c2_i32 : i32 to vector<8x128xi32>
    %10 = arith.cmpi slt, %8, %9 : vector<8x128xi32>
    %11 = tpu.iota {dimensions = array<i32: 1>} : vector<8x128xi32>
    %c128_i32 = arith.constant 128 : i32
    %12 = arith.muli %arg1, %c128_i32 : i32
    %13 = vector.broadcast %12 : i32 to vector<8x128xi32>
    %14 = arith.addi %11, %13 : vector<8x128xi32>
    %c4_i32 = arith.constant 4 : i32
    %15 = vector.broadcast %c4_i32 : i32 to vector<8x128xi32>
    %16 = arith.cmpi slt, %14, %15 : vector<8x128xi32>
    %17 = arith.andi %10, %16 : vector<8x128xi1>
    %cst = arith.constant 5.000000e-01 : f32
    %18 = vector.broadcast %cst : f32 to vector<8x128xf32>
    %19 = arith.cmpf ogt, %3, %18 : vector<8x128xf32>
    %cst_4 = arith.constant 1.000000e+00 : f32
    %cst_5 = arith.constant 0.000000e+00 : f32
    %20 = vector.broadcast %cst_4 : f32 to vector<8x128xf32>
    %21 = vector.broadcast %cst_5 : f32 to vector<8x128xf32>
    %22 = arith.select %19, %20, %21 : vector<8x128xi1>, vector<8x128xf32>
    %23 = arith.subf %3, %22 : vector<8x128xf32>
    %cst_6 = arith.constant 2.500000e-01 : f32
    %24 = vector.broadcast %cst_6 : f32 to vector<8x128xf32>
    %25 = arith.mulf %23, %24 : vector<8x128xf32>
    %26 = arith.subf %4, %3 : vector<8x128xf32>
    %27 = arith.addf %26, %25 : vector<8x128xf32>
    %28 = arith.mulf %25, %25 : vector<8x128xf32>
    %29 = arith.mulf %27, %27 : vector<8x128xf32>
    %30 = arith.addf %28, %29 : vector<8x128xf32>
    %31 = arith.index_cast %arg0 : i32 to index
    %32 = memref.load %arg2[%31] : memref<1xi32, #tpu.memory_space<smem>>
    %c0_i32_7 = arith.constant 0 : i32
    %33 = arith.cmpi ne, %32, %c0_i32_7 : i32
    %34 = arith.extui %33 : i1 to i32
    %c0_i32_8 = arith.constant 0 : i32
    %35 = arith.cmpi ne, %34, %c0_i32_8 : i32
    scf.if %35 {
      %c0_13 = arith.constant 0 : index
      %c0_14 = arith.constant 0 : index
      %44 = vector.load %arg5[%c0_13, %c0_14] : memref<8x128xf32, #tpu.memory_space<vmem>>, vector<8x128xf32>
      %c0_15 = arith.constant 0 : index
      %c0_16 = arith.constant 0 : index
      %45 = vector.load %arg6[%c0_15, %c0_16] : memref<8x1xf32, #tpu.memory_space<vmem>>, vector<8x1xf32>
      %46 = math.log %3 : vector<8x128xf32>
      %cst_17 = arith.constant -1.000000e+02 : f32
      %47 = vector.broadcast %cst_17 : f32 to vector<8x128xf32>
      %48 = arith.maximumf %46, %47 : vector<8x128xf32>
      %cst_18 = arith.constant 1.000000e+00 : f32
      %49 = vector.broadcast %cst_18 : f32 to vector<8x128xf32>
      %50 = arith.subf %49, %3 : vector<8x128xf32>
      %51 = math.log %50 : vector<8x128xf32>
      %cst_19 = arith.constant -1.000000e+02 : f32
      %52 = vector.broadcast %cst_19 : f32 to vector<8x128xf32>
      %53 = arith.maximumf %51, %52 : vector<8x128xf32>
      %54 = arith.subf %48, %53 : vector<8x128xf32>
      %55 = arith.mulf %44, %54 : vector<8x128xf32>
      %56 = arith.addf %53, %55 : vector<8x128xf32>
      %57 = vector.broadcast %45 : vector<8x1xf32> to vector<8x128xf32>
      %58 = arith.mulf %57, %56 : vector<8x128xf32>
      %59 = arith.subf %30, %58 : vector<8x128xf32>
      %cst_20 = arith.constant 0.000000e+00 : f32
      %60 = vector.broadcast %cst_20 : f32 to vector<8x128xf32>
      %61 = arith.select %17, %59, %60 : vector<8x128xi1>, vector<8x128xf32>
      %c0_21 = arith.constant 0 : index
      %c0_22 = arith.constant 0 : index
      %62 = vector.load %arg8[%c0_21, %c0_22] : memref<8x128xf32, #tpu.memory_space<vmem>>, vector<8x128xf32>
      %63 = vector.shape_cast %61 : vector<8x128xf32> to vector<1x8x128xf32>
      %cst_23 = arith.constant dense<0.000000e+00> : vector<8x128xf32>
      %64 = vector.multi_reduction <add>, %63, %cst_23 [0] : vector<1x8x128xf32> to vector<8x128xf32>
      %65 = arith.addf %62, %64 : vector<8x128xf32>
      %c0_24 = arith.constant 0 : index
      %c0_25 = arith.constant 0 : index
      %66 = vector.load %arg8[%c0_24, %c0_25] : memref<8x128xf32, #tpu.memory_space<vmem>>, vector<8x128xf32>
      tpu.vector_store %arg8[%c0_24, %c0_25], %65 {strides = array<i32>} : memref<8x128xf32, #tpu.memory_space<vmem>>, vector<8x128xf32>,
    } else {
    }
    %36 = arith.index_cast %arg0 : i32 to index
    %37 = memref.load %arg2[%36] : memref<1xi32, #tpu.memory_space<smem>>
    %c0_i32_9 = arith.constant 0 : i32
    %38 = arith.cmpi eq, %37, %c0_i32_9 : i32
    %39 = arith.extui %38 : i1 to i32
    %c0_i32_10 = arith.constant 0 : i32
    %40 = arith.cmpi ne, %39, %c0_i32_10 : i32
    scf.if %40 {
      %cst_13 = arith.constant 0.000000e+00 : f32
      %44 = vector.broadcast %cst_13 : f32 to vector<8x128xf32>
      %45 = arith.select %17, %30, %44 : vector<8x128xi1>, vector<8x128xf32>
      %c0_14 = arith.constant 0 : index
      %c0_15 = arith.constant 0 : index
      %46 = vector.load %arg8[%c0_14, %c0_15] : memref<8x128xf32, #tpu.memory_space<vmem>>, vector<8x128xf32>
      %47 = vector.shape_cast %45 : vector<8x128xf32> to vector<1x8x128xf32>
      %cst_16 = arith.constant dense<0.000000e+00> : vector<8x128xf32>
      %48 = vector.multi_reduction <add>, %47, %cst_16 [0] : vector<1x8x128xf32> to vector<8x128xf32>
      %49 = arith.addf %46, %48 : vector<8x128xf32>
      %c0_17 = arith.constant 0 : index
      %c0_18 = arith.constant 0 : index
      %50 = vector.load %arg8[%c0_17, %c0_18] : memref<8x128xf32, #tpu.memory_space<vmem>>, vector<8x128xf32>
      tpu.vector_store %arg8[%c0_17, %c0_18], %49 {strides = array<i32>} : memref<8x128xf32, #tpu.memory_space<vmem>>, vector<8x128xf32>,
    } else {
    }
    %c0_i32_11 = arith.constant 0 : i32
    %41 = arith.cmpi eq, %arg1, %c0_i32_11 : i32
    %42 = arith.extui %41 : i1 to i32
    %c0_i32_12 = arith.constant 0 : i32
    %43 = arith.cmpi ne, %42, %c0_i32_12 : i32
    scf.if %43 {
      %c0_13 = arith.constant 0 : index
      %c0_14 = arith.constant 0 : index
      %44 = vector.load %arg8[%c0_13, %c0_14] : memref<8x128xf32, #tpu.memory_space<vmem>>, vector<8x128xf32>
      %45 = vector.shape_cast %44 : vector<8x128xf32> to vector<8x1x128xf32>
      %cst_15 = arith.constant dense<0.000000e+00> : vector<8x128xf32>
      %46 = vector.multi_reduction <add>, %45, %cst_15 [1] : vector<8x1x128xf32> to vector<8x128xf32>
      %c0_16 = arith.constant 0 : index
      %c0_17 = arith.constant 0 : index
      %47 = vector.load %arg7[%c0_16, %c0_17] : memref<8x128xf32, #tpu.memory_space<vmem>>, vector<8x128xf32>
      tpu.vector_store %arg7[%c0_16, %c0_17], %46 {strides = array<i32>} : memref<8x128xf32, #tpu.memory_space<vmem>>, vector<8x128xf32>,
    } else {
    }
    return
  }
  func.func @transform_0(%arg0: i32, %arg1: i32, %arg2: memref<1xi32, #tpu.memory_space<smem>>) -> (i32, i32) {
    %c0_i32 = arith.constant 0 : i32
    return %arg0, %arg1 : i32, i32
  }
  func.func @transform_1(%arg0: i32, %arg1: i32, %arg2: memref<1xi32, #tpu.memory_space<smem>>) -> (i32, i32) {
    %c0_i32 = arith.constant 0 : i32
    return %arg0, %arg1 : i32, i32
  }
  func.func @transform_2(%arg0: i32, %arg1: i32, %arg2: memref<1xi32, #tpu.memory_space<smem>>) -> (i32, i32) {
    %c0_i32 = arith.constant 0 : i32
    return %arg0, %arg1 : i32, i32
  }
  func.func @transform_3(%arg0: i32, %arg1: i32, %arg2: memref<1xi32, #tpu.memory_space<smem>>) -> (i32, i32) {
    %c0_i32 = arith.constant 0 : i32
    %c0_i32_0 = arith.constant 0 : i32
    return %arg0, %c0_i32 : i32, i32
  }
  func.func @transform_4(%arg0: i32, %arg1: i32, %arg2: memref<1xi32, #tpu.memory_space<smem>>) -> (i32, i32) {
    %c0_i32 = arith.constant 0 : i32
    %c0_i32_0 = arith.constant 0 : i32
    return %arg0, %c0_i32 : i32, i32
  }
}

</mosaic_0001>

<bundles_post_ra>
// kernel: tpu_custom_call.1
= control target key start
LH: loop header
LB: loop body
LE: loop exit
PB: predicated region body
PF: predicated region fallthrough
CT: control target
= control target key end

     0   :  { %s210_s0 = inlined_call_operand.<no memory space> [shape: s32[1], index: 0, kind: input, shape index: {}]   ;;  %s211_s1 = inlined_call_operand.vmem [shape: f32[2,4], index: 1, kind: input, shape index: {}]   ;;  %s212_s2 = inlined_call_operand.vmem [shape: f32[2,4], index: 2, kind: input, shape index: {}]   ;;  %s213_s3 = inlined_call_operand.vmem [shape: f32[2,4], index: 3, kind: input, shape index: {}]   ;;  %s214_s4 = inlined_call_operand.vmem [shape: f32[2,1], index: 4, kind: input, shape index: {}]   ;;  %s215_s5 = inlined_call_operand.hbm [shape: f32[8,128], index: 5, kind: output, shape index: {}]  }
   0x1   :  { %10 = sst [smem:[#allocation4]] %s210_s0 }
   0x2   :  { %11 = vsyncpa [#allocation6], 0  ;;  %v25_v0 = vld [vmem:[%s211_s1] sm:$0xff]  ;;  %v27_v2 = vlaneseq  ;;  %v142_v3 = vmov 0.0   ;;  %s49_s24 = sld [smem:[#allocation4]] }
   0x3   :  { %v26_v1 = vld [vmem:[%s212_s2] sm:$0xff]  ;;  %24 = vst [vmem:[#allocation2] sm:$0xff] %v142_v3  ;;  %vm40_vm0 = vcmp.gt.f32.partialorder %v25_v0, 0.5 }
   0x4   :  { %v41_v4 = vsel %vm40_vm0, 1.0, %v142_v3  ;;  %v28_v5 = vshrl.u32 %v27_v2, 7  ;;  %v34_v6 = vand.u32 127, %v27_v2  ;;  %v44_v8 = vsub.f32 %v26_v1, %v25_v0 }
   0x5   :  { %v42_v7 = vsub.f32 %v25_v0, %v41_v4 }
   0x6   :  { %vm32_vm1 = vcmp.lt.s32.totalorder %v28_v5, 2  ;;  %vm38_vm2 = vcmp.lt.s32.totalorder %v34_v6, 4 }
   0x7   :  { %v43_v9 = vmul.f32 0.25, %v42_v7  ;;  %vm184_vm3 = vmand %vm32_vm1, %vm38_vm2 }
   0x8   :  { %p108_p0 = scmp.eq.s32.totalorder %s49_s24, 0 }
   0x9   :  { %v45_v11 = vadd.f32 %v44_v8, %v43_v9  ;;  %v46_v12 = vmul.f32 %v43_v9, %v43_v9  ;;  %v55_v15 = vld [vmem:[%s214_s4] sm:$0xff] (!%p108_p0)  ;;  %v143_v16 = vmov (!%p108_p0), 0   ;;  %v59_v17 = vsub.f32 (!%p108_p0), 1.0, %v25_v0 }
   0xa   :  { %53 = sbr.rel (%p108_p0) target bundleno = 147 (0x93), region = 25  ;;  %113 = vset.pattern.permute.xlu0 (!%p108_p0), %v143_v16  ;;  %114 = vlog2.f32 (!%p108_p0), %v25_v0  ;;  %v54_v25 = vld [vmem:[%s213_s3] sm:$0xff] (!%p108_p0) }
   0xb   :  { %v47_v13 = vmul.f32 %v45_v11, %v45_v11  ;;  %68 = vperm.xlu0 (!%p108_p0), %113, %v55_v15   ;;  %116 = vlog2.f32 (!%p108_p0), %v59_v17  ;;  %v74_v30 = vld [vmem:[#allocation2] sm:$0xff] (!%p108_p0) }
   0xd   :  { %v48_v14 = vadd.f32 %v47_v13, %v46_v12 }
  0x14   :  { %v115_v18 = vpop.eup %114 }
  0x15   :  { %v117_v19 = vpop.eup %116  ;;  %v57_v20 = vmul.f32 0.6931472, %v115_v18 }
  0x16   :  { %v61_v21 = vmul.f32 0.6931472, %v117_v19 }
  0x17   :  { %v58_v22 = vmax.f32 %v57_v20, -100.0 }
  0x18   :  { %v62_v23 = vmax.f32 %v61_v21, -100.0 }
  0x1a   :  { %v63_v24 = vsub.f32 %v58_v22, %v62_v23 }
  0x1c   :  { %v64_v26 = vmul.f32 %v63_v24, %v54_v25 }
  0x1e   :  { %v65_v27 = vadd.f32 %v64_v26, %v62_v23 }
  0x8a   :  { %v69_v28 = vpop.permute.xlu0 %68 }
  0x8b   :  { %v71_v29 = vmul.f32 %v69_v28, %v65_v27 }
  0x8d   :  { %v72_v31 = vsub.f32 %v48_v14, %v71_v29 }
  0x8f   :  { %v73_v32 = vsel %vm184_vm3, %v72_v31, 0.0 }
  0x90   :  { %v76_v33 = vadd.f32 %v74_v30, %v73_v32 }
  0x92   :  { %77 = vst [vmem:[#allocation2] sm:$0xff] %v76_v33 }
  0x93 PF:  { %s78_s4 = sld [smem:[#allocation4]] }
  0x99   :  { %p109_p1 = scmp.ne.s32.totalorder %s78_s4, 0 }
  0x9a   :  { %v83_v34 = vsel (!%p109_p1), %vm184_vm3, %v48_v14, 0.0  ;;  %v84_v35 = vld [vmem:[#allocation2] sm:$0xff] (!%p109_p1) }
  0x9b   :  { %82 = sbr.rel (%p109_p1) target bundleno = 162 (0xa2), region = 29  ;;  %v86_v36 = vadd.f32 (!%p109_p1), %v84_v35, %v83_v34 }
  0x9d   :  { %87 = vst [vmem:[#allocation2] sm:$0xff] (!%p109_p1), %v86_v36 }
  0xa2 PF:  { %s144_s3 = smov [#allocation5]  }
  0xa3   :  { %s100_s26 = sshll.u32 %s144_s3, 4  ;;  %s101_s26 = int_to_ptr.vmem [resolvable:$true] %s100_s26 }
  0xa4   :  { %v91_v37 = vld [vmem:[#allocation2] sm:$0xff]  ;;  %s118_s27 = scalar_lea.vmem %s101_s26, 128  ;;  %p123_p3 = scmp.lt.s32.totalorder %s101_s26, %s101_s26 }
  0xa5   :  { %93 = vst [vmem:[#allocation5] sm:$0xff] %v91_v37  ;;  %p119_p2 = scmp.ne.s32.totalorder %s101_s26, %s118_s27  ;;  %p124_p4 = scmp.lt.s32.totalorder %s118_s27, %s118_s27 }
  0xa7   :  { %p125_p5 = por %p124_p4, %p123_p3 }
  0xa9   :  { %p126_p6 = pnand %p125_p5, %p119_p2 }
  0xab   :  { %129 = shalt.err (!%p126_p6)
}
  0xac   :  { %s130_s30 = scalar_lea.hbm %s215_s5, 128 }
  0xad   :  { %p131_p7 = scmp.ne.s32.totalorder %s215_s5, %s130_s30  ;;  %p134_p8 = scmp.lt.u32.totalorder %s130_s30, %s215_s5 }
  0xaf   :  { %p136_p9 = pnand %p134_p8, %p131_p7 }
  0xb1   :  { %139 = shalt.err (!%p136_p9)
}
  0xb2   :  { %103 = dma.vmem_to_hbm [thread:$0]  %s101_s26, 128, %s215_s5, [#allocation6]  }
  0xb3   :  { %140 = dma.done.wait [#allocation6], 128  }
  0xb4   :  { %141 = vsyncadd [#allocation6], 4294967168 }
  0xb5   :  { %107 = vsyncpa [#allocation6], 1 }

</bundles_post_ra>
